<compile_context>
chip_gen: v7x
topology: tpu7x:2x2x1
jax: 0.10.0
libtpu: 0.0.40
codegen_flags: <defaults>
</compile_context>

<pallas_src>
import functools

import jax
import jax.numpy as jnp
from jax.experimental import pallas as pl
from jax.experimental.pallas import tpu as pltpu


def _round_up(x, m):
    return ((x + m - 1) // m) * m


def _sepconv_kernel(body_ref, halo_ref, dw_ref, pw_ref, o_ref,
                    slab_ref, acc_ref, *, TH, W, K, dilation):
    # body_ref : (1, TH, Wp, Cin_p)    current row tile of the padded input
    # halo_ref : (1, PAD, Wp, Cin_p)   PAD = (K-1)*dilation rows below the tile
    # dw_ref   : (K*K, Cin_p) f32      flattened depthwise taps
    # pw_ref   : (Cin_p, Cout_p) bf16  pointwise weights
    # o_ref    : (1, TH, W, Cout_p)
    # slab_ref : VMEM (TH+PAD, Wp, Cin_p) f32   halo'ed input slab scratch
    # acc_ref  : VMEM (TH, W, Cin_p) f32        depthwise accumulator scratch
    cin_p = slab_ref.shape[-1]
    cout_p = o_ref.shape[-1]

    # Assemble the halo'ed slab once in VMEM scratch.
    slab_ref[:TH] = body_ref[0]
    slab_ref[TH:] = halo_ref[0]

    # Depthwise conv: K*K shifted VPU multiply-accumulates into an explicit
    # f32 VMEM scratch accumulator (bounded vreg pressure).
    dw = dw_ref[...]                                  # (K*K, Cin_p), one load
    for t in range(K * K):
        kh, kw = divmod(t, K)
        r0 = kh * dilation
        c0 = kw * dilation
        tap = slab_ref[r0:r0 + TH, c0:c0 + W, :] * dw[t][None, None, :]
        if t == 0:
            acc_ref[...] = tap
        else:
            acc_ref[...] += tap

    # Pointwise 1x1 conv: (TH*W, Cin_p) x (Cin_p, Cout_p) bf16 matmul on the
    # MXU with f32 accumulation.
    lhs = acc_ref[...].reshape(TH * W, cin_p).astype(jnp.bfloat16)
    y = jnp.dot(lhs, pw_ref[...], preferred_element_type=jnp.float32)
    o_ref[0] = y.reshape(TH, W, cout_p).astype(o_ref.dtype)


def _pick_row_tile(H, W, Wp, cin_p, cout_p, pad_rows, budget_bytes=6 << 20):
    """Row tile: multiple of 8 sublanes AND of pad_rows (so the halo block is
    addressable with plain Blocked indexing), sized to a VMEM budget."""
    unit = 8
    while unit % max(pad_rows, 1):
        unit += 8
    per_row = (2 * Wp * cin_p        # double-buffered input body rows
               + Wp * cin_p          # slab scratch
               + W * cin_p           # f32 accumulator
               + 2 * W * cout_p)     # double-buffered output rows
    per_row *= 4                     # f32 bytes
    th = max(unit, (budget_bytes // max(per_row, 1)) // unit * unit)
    th = min(th, _round_up(H, unit))
    return th, unit


def separable_conv2d(x_nchw, dw_weight, pw_weight, kernel_size=3, stride=1,
                     dilation=1, row_tile=None):
    """SeparableConv2d.forward.

    x_nchw   : (N, Cin, H, W) float32
    dw_weight: (Cin, 1, K, K)    nn.Conv2d(groups=Cin).weight
    pw_weight: (Cout, Cin, 1, 1) nn.Conv2d(1x1).weight
    """
    # TODO(synk): stride=2 depthwise (used by Block downsampling) not implemented.
    assert stride == 1, "only stride=1 SeparableConv2d is implemented"
    assert kernel_size >= 2
    N, Cin, H, W = x_nchw.shape
    K = kernel_size
    Cout = pw_weight.shape[0]

    # fixed_padding amounts (same arithmetic as the PyTorch module).
    k_eff = K + (K - 1) * (dilation - 1)
    pad_total = k_eff - 1
    pad_beg = pad_total // 2
    pad_end = pad_total - pad_beg

    # Pad channels to the 128-lane width: lane-dense stores + full MXU N width.
    cin_p = _round_up(Cin, 128)
    cout_p = _round_up(Cout, 128)
    Wp = W + pad_total

    th, unit = _pick_row_tile(H, W, Wp, cin_p, cout_p, pad_total)
    if row_tile is not None:
        th = max(unit, _round_up(row_tile, unit))
    n_rt = -(-H // th)
    th = _round_up(-(-H // n_rt), unit)     # rebalance: minimal tile covering H
    n_rt = -(-H // th)
    h_out_pad = n_rt * th
    Hp = h_out_pad + pad_total

    # Single NHWC pad pass: fixed_padding + row-tile round-up + channel pad.
    x_nhwc = jnp.transpose(x_nchw, (0, 2, 3, 1))
    x_pad = jnp.pad(
        x_nhwc,
        ((0, 0),
         (pad_beg, pad_end + (h_out_pad - H)),
         (pad_beg, pad_end),
         (0, cin_p - Cin)))

    # Depthwise taps flattened to (K*K, Cin_p) f32; pointwise weights stored
    # bf16 (MXU operands), accumulation stays f32.
    dw = jnp.transpose(dw_weight[:, 0, :, :], (1, 2, 0)).reshape(K * K, Cin)
    dw = jnp.pad(dw, ((0, 0), (0, cin_p - Cin))).astype(jnp.float32)
    pw = jnp.transpose(pw_weight[:, :, 0, 0], (1, 0))
    pw = jnp.pad(pw, ((0, cin_p - Cin), (0, cout_p - Cout))).astype(jnp.bfloat16)

    kern = functools.partial(_sepconv_kernel, TH=th, W=W, K=K, dilation=dilation)

    halo_stride = th // pad_total       # pad_total | th by construction

    # Explicit VMEM budget (double-buffered blocks + scratch), clamped so it is
    # safe on v7x's 64 MiB physical VMEM as well as v5e/v6e.
    vmem_est = (2 * (th * Wp * cin_p * 4 + pad_total * Wp * cin_p * 4
                     + th * W * cout_p * 4 + K * K * cin_p * 4
                     + cin_p * cout_p * 2)
                + (th + pad_total) * Wp * cin_p * 4 + th * W * cin_p * 4)
    vmem_limit = int(min(max(2 * vmem_est, 16 * 1024 * 1024), 56 * 1024 * 1024))

    out_pad = pl.pallas_call(
        kern,
        out_shape=jax.ShapeDtypeStruct((N, h_out_pad, W, cout_p), x_nchw.dtype),
        grid_spec=pltpu.PrefetchScalarGridSpec(
            num_scalar_prefetch=0,
            grid=(N, n_rt),
            in_specs=[
                # Row tile of the padded input: rows [rt*TH, rt*TH+TH).
                pl.BlockSpec((1, th, Wp, cin_p), lambda n, rt: (n, rt, 0, 0)),
                # Bottom halo: pad_total rows starting at (rt+1)*TH, expressed
                # with plain Blocked indexing (pad_total divides TH).
                # NOTE: pipeline_mode=pl.Buffered(3) is an option here for the
                # large-channel layers if DMA latency is exposed.
                pl.BlockSpec((1, pad_total, Wp, cin_p),
                             lambda n, rt: (n, (rt + 1) * halo_stride, 0, 0)),
                pl.BlockSpec((K * K, cin_p), lambda n, rt: (0, 0)),
                pl.BlockSpec((cin_p, cout_p), lambda n, rt: (0, 0)),
            ],
            out_specs=pl.BlockSpec((1, th, W, cout_p),
                                   lambda n, rt: (n, rt, 0, 0)),
            scratch_shapes=[
                pltpu.VMEM((th + pad_total, Wp, cin_p), jnp.float32),
                pltpu.VMEM((th, W, cin_p), jnp.float32),
            ]),
        compiler_params=pltpu.CompilerParams(
            dimension_semantics=("parallel", "parallel"),
            vmem_limit_bytes=vmem_limit),
    )(x_pad, x_pad, dw, pw)

    # Strip row-tile / channel padding, back to NCHW.
    # TODO(synk): in a full Xception graph, keep activations NHWC end-to-end
    # and fuse BN/ReLU/residual adds around this kernel instead of transposing
    # per layer.
    out = out_pad[:, :H, :, :Cout]
    return jnp.transpose(out, (0, 3, 1, 2))


def _reference(x_nchw, dw_weight, pw_weight, kernel_size=3, dilation=1):
    """Pure-JAX (f32) reference matching the PyTorch module."""
    K = kernel_size
    k_eff = K + (K - 1) * (dilation - 1)
    pad_total = k_eff - 1
    pad_beg = pad_total // 2
    pad_end = pad_total - pad_beg
    Cin = x_nchw.shape[1]
    xp = jnp.pad(x_nchw, ((0, 0), (0, 0), (pad_beg, pad_end), (pad_beg, pad_end)))
    depth = jax.lax.conv_general_dilated(
        xp, dw_weight, window_strides=(1, 1), padding="VALID",
        rhs_dilation=(dilation, dilation), feature_group_count=Cin,
        dimension_numbers=("NCHW", "OIHW", "NCHW"))
    point = jax.lax.conv_general_dilated(
        depth, pw_weight, window_strides=(1, 1), padding="VALID",
        dimension_numbers=("NCHW", "OIHW", "NCHW"))
    return point


if __name__ == "__main__":
    key = jax.random.PRNGKey(0)
    k_x, k_dw, k_pw = jax.random.split(key, 3)

    N, Cin, Cout, H, W, K = 2, 4, 8, 16, 16, 3

    x = jax.random.normal(k_x, (N, Cin, H, W), dtype=jnp.float32)
    # nn.Conv2d weight shapes: deep_conv (Cin,1,K,K); point_wise (Cout,Cin,1,1).
    dw_w = jax.random.normal(k_dw, (Cin, 1, K, K), dtype=jnp.float32) * 0.1
    pw_w = jax.random.normal(k_pw, (Cout, Cin, 1, 1), dtype=jnp.float32) * 0.1

    # dilation=1 path, forcing 2 row tiles to exercise the halo machinery.
    out = separable_conv2d(x, dw_w, pw_w, kernel_size=K, dilation=1, row_tile=8)
    out = jax.block_until_ready(out)
    ref = _reference(x, dw_w, pw_w, kernel_size=K, dilation=1)
    ref = jax.block_until_ready(ref)
    assert out.shape == (N, Cout, H, W), out.shape
    # bf16 MXU operands -> slightly looser tolerance than pure f32.
    assert jnp.allclose(out, ref, atol=3e-2, rtol=3e-2), \
        float(jnp.abs(out - ref).max())

    # dilation=2 path (Xception exit flow / out_stride=8 middle flow), auto tile.
    out2 = separable_conv2d(x, dw_w, pw_w, kernel_size=K, dilation=2)
    out2 = jax.block_until_ready(out2)
    ref2 = jax.block_until_ready(_reference(x, dw_w, pw_w, kernel_size=K, dilation=2))
    assert out2.shape == (N, Cout, H, W), out2.shape
    assert jnp.allclose(out2, ref2, atol=3e-2, rtol=3e-2), \
        float(jnp.abs(out2 - ref2).max())

    print("KERNEL_OK")
</pallas_src>

<mosaic_0001>
module attributes {stable_mosaic.version = 11 : i64} {
  func.func @_sepconv_kernel(%arg0: i32, %arg1: i32, %arg2: memref<1x8x18x128xf32, #tpu.memory_space<vmem>>, %arg3: memref<1x2x18x128xf32, #tpu.memory_space<vmem>>, %arg4: memref<9x128xf32, #tpu.memory_space<vmem>>, %arg5: memref<128x128xbf16, #tpu.memory_space<vmem>>, %arg6: memref<1x8x16x128xf32, #tpu.memory_space<vmem>>, %arg7: memref<10x18x128xf32, #tpu.memory_space<vmem>>, %arg8: memref<8x16x128xf32, #tpu.memory_space<vmem>>) attributes {dimension_semantics = [#tpu.dimension_semantics<parallel>, #tpu.dimension_semantics<parallel>], iteration_bounds = array<i64: 2, 2>, scalar_prefetch = 0 : i64, scratch_operands = 2 : i64, tpu.core_type = #tpu.core_type<tc>, window_params = [{transform_indices = @transform_0, window_bounds = array<i64: 1, 8, 18, 128>}, {transform_indices = @transform_1, window_bounds = array<i64: 1, 2, 18, 128>}, {pipeline_mode = #tpu.pipeline_mode<synchronous>, transform_indices = @transform_2, window_bounds = array<i64: 9, 128>}, {pipeline_mode = #tpu.pipeline_mode<synchronous>, transform_indices = @transform_3, window_bounds = array<i64: 128, 128>}, {transform_indices = @transform_4, window_bounds = array<i64: 1, 8, 16, 128>}]} {
    %c0 = arith.constant 0 : index
    %c0_0 = arith.constant 0 : index
    %c0_1 = arith.constant 0 : index
    %c0_2 = arith.constant 0 : index
    %0 = vector.load %arg2[%c0, %c0_0, %c0_1, %c0_2] : memref<1x8x18x128xf32, #tpu.memory_space<vmem>>, vector<1x8x18x128xf32>
    %1 = vector.shape_cast %0 : vector<1x8x18x128xf32> to vector<8x18x128xf32>
    %c0_3 = arith.constant 0 : index
    %c0_4 = arith.constant 0 : index
    %c0_5 = arith.constant 0 : index
    %2 = vector.load %arg7[%c0_3, %c0_4, %c0_5] : memref<10x18x128xf32, #tpu.memory_space<vmem>>, vector<8x18x128xf32>
    tpu.vector_store %arg7[%c0_3, %c0_4, %c0_5], %1 {strides = array<i32>} : memref<10x18x128xf32, #tpu.memory_space<vmem>>, vector<8x18x128xf32>,
    %c0_6 = arith.constant 0 : index
    %c0_7 = arith.constant 0 : index
    %c0_8 = arith.constant 0 : index
    %c0_9 = arith.constant 0 : index
    %3 = vector.load %arg3[%c0_6, %c0_7, %c0_8, %c0_9] : memref<1x2x18x128xf32, #tpu.memory_space<vmem>>, vector<1x2x18x128xf32>
    %4 = vector.shape_cast %3 : vector<1x2x18x128xf32> to vector<2x18x128xf32>
    %c8 = arith.constant 8 : index
    %c0_10 = arith.constant 0 : index
    %c0_11 = arith.constant 0 : index
    %5 = vector.load %arg7[%c8, %c0_10, %c0_11] : memref<10x18x128xf32, #tpu.memory_space<vmem>>, vector<2x18x128xf32>
    tpu.vector_store %arg7[%c8, %c0_10, %c0_11], %4 {strides = array<i32>} : memref<10x18x128xf32, #tpu.memory_space<vmem>>, vector<2x18x128xf32>,
    %c0_12 = arith.constant 0 : index
    %c0_13 = arith.constant 0 : index
    %6 = vector.load %arg4[%c0_12, %c0_13] : memref<9x128xf32, #tpu.memory_space<vmem>>, vector<9x128xf32>
    %c0_14 = arith.constant 0 : index
    %c0_15 = arith.constant 0 : index
    %c0_16 = arith.constant 0 : index
    %7 = vector.load %arg7[%c0_14, %c0_15, %c0_16] : memref<10x18x128xf32, #tpu.memory_space<vmem>>, vector<8x16x128xf32>
    %8 = vector.extract_strided_slice %6 {offsets = [0, 0], sizes = [1, 128], strides = [1, 1]} : vector<9x128xf32> to vector<1x128xf32>
    %9 = vector.shape_cast %8 : vector<1x128xf32> to vector<128xf32>
    %10 = vector.shape_cast %9 : vector<128xf32> to vector<1x1x128xf32>
    %11 = vector.broadcast %10 : vector<1x1x128xf32> to vector<8x16x128xf32>
    %12 = arith.mulf %7, %11 : vector<8x16x128xf32>
    %c0_17 = arith.constant 0 : index
    %c0_18 = arith.constant 0 : index
    %c0_19 = arith.constant 0 : index
    %13 = vector.load %arg8[%c0_17, %c0_18, %c0_19] : memref<8x16x128xf32, #tpu.memory_space<vmem>>, vector<8x16x128xf32>
    tpu.vector_store %arg8[%c0_17, %c0_18, %c0_19], %12 {strides = array<i32>} : memref<8x16x128xf32, #tpu.memory_space<vmem>>, vector<8x16x128xf32>,
    %c0_20 = arith.constant 0 : index
    %c1 = arith.constant 1 : index
    %c0_21 = arith.constant 0 : index
    %14 = vector.load %arg7[%c0_20, %c1, %c0_21] : memref<10x18x128xf32, #tpu.memory_space<vmem>>, vector<8x16x128xf32>
    %15 = vector.extract_strided_slice %6 {offsets = [1, 0], sizes = [1, 128], strides = [1, 1]} : vector<9x128xf32> to vector<1x128xf32>
    %16 = vector.shape_cast %15 : vector<1x128xf32> to vector<128xf32>
    %17 = vector.shape_cast %16 : vector<128xf32> to vector<1x1x128xf32>
    %18 = vector.broadcast %17 : vector<1x1x128xf32> to vector<8x16x128xf32>
    %19 = arith.mulf %14, %18 : vector<8x16x128xf32>
    %c0_22 = arith.constant 0 : index
    %c0_23 = arith.constant 0 : index
    %c0_24 = arith.constant 0 : index
    %20 = vector.load %arg8[%c0_22, %c0_23, %c0_24] : memref<8x16x128xf32, #tpu.memory_space<vmem>>, vector<8x16x128xf32>
    %21 = arith.addf %20, %19 : vector<8x16x128xf32>
    %c0_25 = arith.constant 0 : index
    %c0_26 = arith.constant 0 : index
    %c0_27 = arith.constant 0 : index
    %22 = vector.load %arg8[%c0_25, %c0_26, %c0_27] : memref<8x16x128xf32, #tpu.memory_space<vmem>>, vector<8x16x128xf32>
    tpu.vector_store %arg8[%c0_25, %c0_26, %c0_27], %21 {strides = array<i32>} : memref<8x16x128xf32, #tpu.memory_space<vmem>>, vector<8x16x128xf32>,
    %c0_28 = arith.constant 0 : index
    %c2 = arith.constant 2 : index
    %c0_29 = arith.constant 0 : index
    %23 = vector.load %arg7[%c0_28, %c2, %c0_29] : memref<10x18x128xf32, #tpu.memory_space<vmem>>, vector<8x16x128xf32>
    %24 = vector.extract_strided_slice %6 {offsets = [2, 0], sizes = [1, 128], strides = [1, 1]} : vector<9x128xf32> to vector<1x128xf32>
    %25 = vector.shape_cast %24 : vector<1x128xf32> to vector<128xf32>
    %26 = vector.shape_cast %25 : vector<128xf32> to vector<1x1x128xf32>
    %27 = vector.broadcast %26 : vector<1x1x128xf32> to vector<8x16x128xf32>
    %28 = arith.mulf %23, %27 : vector<8x16x128xf32>
    %c0_30 = arith.constant 0 : index
    %c0_31 = arith.constant 0 : index
    %c0_32 = arith.constant 0 : index
    %29 = vector.load %arg8[%c0_30, %c0_31, %c0_32] : memref<8x16x128xf32, #tpu.memory_space<vmem>>, vector<8x16x128xf32>
    %30 = arith.addf %29, %28 : vector<8x16x128xf32>
    %c0_33 = arith.constant 0 : index
    %c0_34 = arith.constant 0 : index
    %c0_35 = arith.constant 0 : index
    %31 = vector.load %arg8[%c0_33, %c0_34, %c0_35] : memref<8x16x128xf32, #tpu.memory_space<vmem>>, vector<8x16x128xf32>
    tpu.vector_store %arg8[%c0_33, %c0_34, %c0_35], %30 {strides = array<i32>} : memref<8x16x128xf32, #tpu.memory_space<vmem>>, vector<8x16x128xf32>,
    %c1_36 = arith.constant 1 : index
    %c0_37 = arith.constant 0 : index
    %c0_38 = arith.constant 0 : index
    %32 = vector.load %arg7[%c1_36, %c0_37, %c0_38] : memref<10x18x128xf32, #tpu.memory_space<vmem>>, vector<8x16x128xf32>
    %33 = vector.extract_strided_slice %6 {offsets = [3, 0], sizes = [1, 128], strides = [1, 1]} : vector<9x128xf32> to vector<1x128xf32>
    %34 = vector.shape_cast %33 : vector<1x128xf32> to vector<128xf32>
    %35 = vector.shape_cast %34 : vector<128xf32> to vector<1x1x128xf32>
    %36 = vector.broadcast %35 : vector<1x1x128xf32> to vector<8x16x128xf32>
    %37 = arith.mulf %32, %36 : vector<8x16x128xf32>
    %c0_39 = arith.constant 0 : index
    %c0_40 = arith.constant 0 : index
    %c0_41 = arith.constant 0 : index
    %38 = vector.load %arg8[%c0_39, %c0_40, %c0_41] : memref<8x16x128xf32, #tpu.memory_space<vmem>>, vector<8x16x128xf32>
    %39 = arith.addf %38, %37 : vector<8x16x128xf32>
    %c0_42 = arith.constant 0 : index
    %c0_43 = arith.constant 0 : index
    %c0_44 = arith.constant 0 : index
    %40 = vector.load %arg8[%c0_42, %c0_43, %c0_44] : memref<8x16x128xf32, #tpu.memory_space<vmem>>, vector<8x16x128xf32>
    tpu.vector_store %arg8[%c0_42, %c0_43, %c0_44], %39 {strides = array<i32>} : memref<8x16x128xf32, #tpu.memory_space<vmem>>, vector<8x16x128xf32>,
    %c1_45 = arith.constant 1 : index
    %c1_46 = arith.constant 1 : index
    %c0_47 = arith.constant 0 : index
    %41 = vector.load %arg7[%c1_45, %c1_46, %c0_47] : memref<10x18x128xf32, #tpu.memory_space<vmem>>, vector<8x16x128xf32>
    %42 = vector.extract_strided_slice %6 {offsets = [4, 0], sizes = [1, 128], strides = [1, 1]} : vector<9x128xf32> to vector<1x128xf32>
    %43 = vector.shape_cast %42 : vector<1x128xf32> to vector<128xf32>
    %44 = vector.shape_cast %43 : vector<128xf32> to vector<1x1x128xf32>
    %45 = vector.broadcast %44 : vector<1x1x128xf32> to vector<8x16x128xf32>
    %46 = arith.mulf %41, %45 : vector<8x16x128xf32>
    %c0_48 = arith.constant 0 : index
    %c0_49 = arith.constant 0 : index
    %c0_50 = arith.constant 0 : index
    %47 = vector.load %arg8[%c0_48, %c0_49, %c0_50] : memref<8x16x128xf32, #tpu.memory_space<vmem>>, vector<8x16x128xf32>
    %48 = arith.addf %47, %46 : vector<8x16x128xf32>
    %c0_51 = arith.constant 0 : index
    %c0_52 = arith.constant 0 : index
    %c0_53 = arith.constant 0 : index
    %49 = vector.load %arg8[%c0_51, %c0_52, %c0_53] : memref<8x16x128xf32, #tpu.memory_space<vmem>>, vector<8x16x128xf32>
    tpu.vector_store %arg8[%c0_51, %c0_52, %c0_53], %48 {strides = array<i32>} : memref<8x16x128xf32, #tpu.memory_space<vmem>>, vector<8x16x128xf32>,
    %c1_54 = arith.constant 1 : index
    %c2_55 = arith.constant 2 : index
    %c0_56 = arith.constant 0 : index
    %50 = vector.load %arg7[%c1_54, %c2_55, %c0_56] : memref<10x18x128xf32, #tpu.memory_space<vmem>>, vector<8x16x128xf32>
    %51 = vector.extract_strided_slice %6 {offsets = [5, 0], sizes = [1, 128], strides = [1, 1]} : vector<9x128xf32> to vector<1x128xf32>
    %52 = vector.shape_cast %51 : vector<1x128xf32> to vector<128xf32>
    %53 = vector.shape_cast %52 : vector<128xf32> to vector<1x1x128xf32>
    %54 = vector.broadcast %53 : vector<1x1x128xf32> to vector<8x16x128xf32>
    %55 = arith.mulf %50, %54 : vector<8x16x128xf32>
    %c0_57 = arith.constant 0 : index
    %c0_58 = arith.constant 0 : index
    %c0_59 = arith.constant 0 : index
    %56 = vector.load %arg8[%c0_57, %c0_58, %c0_59] : memref<8x16x128xf32, #tpu.memory_space<vmem>>, vector<8x16x128xf32>
    %57 = arith.addf %56, %55 : vector<8x16x128xf32>
    %c0_60 = arith.constant 0 : index
    %c0_61 = arith.constant 0 : index
    %c0_62 = arith.constant 0 : index
    %58 = vector.load %arg8[%c0_60, %c0_61, %c0_62] : memref<8x16x128xf32, #tpu.memory_space<vmem>>, vector<8x16x128xf32>
    tpu.vector_store %arg8[%c0_60, %c0_61, %c0_62], %57 {strides = array<i32>} : memref<8x16x128xf32, #tpu.memory_space<vmem>>, vector<8x16x128xf32>,
    %c2_63 = arith.constant 2 : index
    %c0_64 = arith.constant 0 : index
    %c0_65 = arith.constant 0 : index
    %59 = vector.load %arg7[%c2_63, %c0_64, %c0_65] : memref<10x18x128xf32, #tpu.memory_space<vmem>>, vector<8x16x128xf32>
    %60 = vector.extract_strided_slice %6 {offsets = [6, 0], sizes = [1, 128], strides = [1, 1]} : vector<9x128xf32> to vector<1x128xf32>
    %61 = vector.shape_cast %60 : vector<1x128xf32> to vector<128xf32>
    %62 = vector.shape_cast %61 : vector<128xf32> to vector<1x1x128xf32>
    %63 = vector.broadcast %62 : vector<1x1x128xf32> to vector<8x16x128xf32>
    %64 = arith.mulf %59, %63 : vector<8x16x128xf32>
    %c0_66 = arith.constant 0 : index
    %c0_67 = arith.constant 0 : index
    %c0_68 = arith.constant 0 : index
    %65 = vector.load %arg8[%c0_66, %c0_67, %c0_68] : memref<8x16x128xf32, #tpu.memory_space<vmem>>, vector<8x16x128xf32>
    %66 = arith.addf %65, %64 : vector<8x16x128xf32>
    %c0_69 = arith.constant 0 : index
    %c0_70 = arith.constant 0 : index
    %c0_71 = arith.constant 0 : index
    %67 = vector.load %arg8[%c0_69, %c0_70, %c0_71] : memref<8x16x128xf32, #tpu.memory_space<vmem>>, vector<8x16x128xf32>
    tpu.vector_store %arg8[%c0_69, %c0_70, %c0_71], %66 {strides = array<i32>} : memref<8x16x128xf32, #tpu.memory_space<vmem>>, vector<8x16x128xf32>,
    %c2_72 = arith.constant 2 : index
    %c1_73 = arith.constant 1 : index
    %c0_74 = arith.constant 0 : index
    %68 = vector.load %arg7[%c2_72, %c1_73, %c0_74] : memref<10x18x128xf32, #tpu.memory_space<vmem>>, vector<8x16x128xf32>
    %69 = vector.extract_strided_slice %6 {offsets = [7, 0], sizes = [1, 128], strides = [1, 1]} : vector<9x128xf32> to vector<1x128xf32>
    %70 = vector.shape_cast %69 : vector<1x128xf32> to vector<128xf32>
    %71 = vector.shape_cast %70 : vector<128xf32> to vector<1x1x128xf32>
    %72 = vector.broadcast %71 : vector<1x1x128xf32> to vector<8x16x128xf32>
    %73 = arith.mulf %68, %72 : vector<8x16x128xf32>
    %c0_75 = arith.constant 0 : index
    %c0_76 = arith.constant 0 : index
    %c0_77 = arith.constant 0 : index
    %74 = vector.load %arg8[%c0_75, %c0_76, %c0_77] : memref<8x16x128xf32, #tpu.memory_space<vmem>>, vector<8x16x128xf32>
    %75 = arith.addf %74, %73 : vector<8x16x128xf32>
    %c0_78 = arith.constant 0 : index
    %c0_79 = arith.constant 0 : index
    %c0_80 = arith.constant 0 : index
    %76 = vector.load %arg8[%c0_78, %c0_79, %c0_80] : memref<8x16x128xf32, #tpu.memory_space<vmem>>, vector<8x16x128xf32>
    tpu.vector_store %arg8[%c0_78, %c0_79, %c0_80], %75 {strides = array<i32>} : memref<8x16x128xf32, #tpu.memory_space<vmem>>, vector<8x16x128xf32>,
    %c2_81 = arith.constant 2 : index
    %c2_82 = arith.constant 2 : index
    %c0_83 = arith.constant 0 : index
    %77 = vector.load %arg7[%c2_81, %c2_82, %c0_83] : memref<10x18x128xf32, #tpu.memory_space<vmem>>, vector<8x16x128xf32>
    %78 = vector.extract_strided_slice %6 {offsets = [8, 0], sizes = [1, 128], strides = [1, 1]} : vector<9x128xf32> to vector<1x128xf32>
    %79 = vector.shape_cast %78 : vector<1x128xf32> to vector<128xf32>
    %80 = vector.shape_cast %79 : vector<128xf32> to vector<1x1x128xf32>
    %81 = vector.broadcast %80 : vector<1x1x128xf32> to vector<8x16x128xf32>
    %82 = arith.mulf %77, %81 : vector<8x16x128xf32>
    %c0_84 = arith.constant 0 : index
    %c0_85 = arith.constant 0 : index
    %c0_86 = arith.constant 0 : index
    %83 = vector.load %arg8[%c0_84, %c0_85, %c0_86] : memref<8x16x128xf32, #tpu.memory_space<vmem>>, vector<8x16x128xf32>
    %84 = arith.addf %83, %82 : vector<8x16x128xf32>
    %c0_87 = arith.constant 0 : index
    %c0_88 = arith.constant 0 : index
    %c0_89 = arith.constant 0 : index
    %85 = vector.load %arg8[%c0_87, %c0_88, %c0_89] : memref<8x16x128xf32, #tpu.memory_space<vmem>>, vector<8x16x128xf32>
    tpu.vector_store %arg8[%c0_87, %c0_88, %c0_89], %84 {strides = array<i32>} : memref<8x16x128xf32, #tpu.memory_space<vmem>>, vector<8x16x128xf32>,
    %c0_90 = arith.constant 0 : index
    %c0_91 = arith.constant 0 : index
    %c0_92 = arith.constant 0 : index
    %86 = vector.load %arg8[%c0_90, %c0_91, %c0_92] : memref<8x16x128xf32, #tpu.memory_space<vmem>>, vector<8x16x128xf32>
    %87 = vector.shape_cast %86 : vector<8x16x128xf32> to vector<128x128xf32>
    %88 = arith.truncf %87 : vector<128x128xf32> to vector<128x128xbf16>
    %c0_93 = arith.constant 0 : index
    %c0_94 = arith.constant 0 : index
    %89 = vector.load %arg5[%c0_93, %c0_94] : memref<128x128xbf16, #tpu.memory_space<vmem>>, vector<128x128xbf16>
    %cst = arith.constant dense<0.000000e+00> : vector<128x128xf32>
    %90 = tpu.matmul %88, %89, %cst {dimension_numbers = #tpu.dot_dimension_numbers<[1], [0], [0], [1], [0, 0, 1, 1], [], []>} : vector<128x128xbf16>, vector<128x128xbf16>, vector<128x128xf32> -> vector<128x128xf32>
    %91 = vector.shape_cast %90 : vector<128x128xf32> to vector<8x16x128xf32>
    %c0_95 = arith.constant 0 : index
    %c0_96 = arith.constant 0 : index
    %c0_97 = arith.constant 0 : index
    %c0_98 = arith.constant 0 : index
    %92 = vector.load %arg6[%c0_95, %c0_96, %c0_97, %c0_98] : memref<1x8x16x128xf32, #tpu.memory_space<vmem>>, vector<1x8x16x128xf32>
    %93 = vector.shape_cast %92 : vector<1x8x16x128xf32> to vector<8x16x128xf32>
    %94 = vector.shape_cast %91 : vector<8x16x128xf32> to vector<1x8x16x128xf32>
    tpu.vector_store %arg6[%c0_95, %c0_96, %c0_97, %c0_98], %94 {strides = array<i32>} : memref<1x8x16x128xf32, #tpu.memory_space<vmem>>, vector<1x8x16x128xf32>,
    return
  }
  func.func @transform_0(%arg0: i32, %arg1: i32) -> (i32, i32, i32, i32) {
    %c0_i32 = arith.constant 0 : i32
    %c0_i32_0 = arith.constant 0 : i32
    %c0_i32_1 = arith.constant 0 : i32
    return %arg0, %arg1, %c0_i32, %c0_i32_0 : i32, i32, i32, i32
  }
  func.func @transform_1(%arg0: i32, %arg1: i32) -> (i32, i32, i32, i32) {
    %c1_i32 = arith.constant 1 : i32
    %0 = arith.addi %arg1, %c1_i32 : i32
    %c4_i32 = arith.constant 4 : i32
    %1 = arith.muli %0, %c4_i32 : i32
    %c0_i32 = arith.constant 0 : i32
    %c0_i32_0 = arith.constant 0 : i32
    %c0_i32_1 = arith.constant 0 : i32
    return %arg0, %1, %c0_i32, %c0_i32_0 : i32, i32, i32, i32
  }
  func.func @transform_2(%arg0: i32, %arg1: i32) -> (i32, i32) {
    %c0_i32 = arith.constant 0 : i32
    %c0_i32_0 = arith.constant 0 : i32
    %c0_i32_1 = arith.constant 0 : i32
    return %c0_i32, %c0_i32_0 : i32, i32
  }
  func.func @transform_3(%arg0: i32, %arg1: i32) -> (i32, i32) {
    %c0_i32 = arith.constant 0 : i32
    %c0_i32_0 = arith.constant 0 : i32
    %c0_i32_1 = arith.constant 0 : i32
    return %c0_i32, %c0_i32_0 : i32, i32
  }
  func.func @transform_4(%arg0: i32, %arg1: i32) -> (i32, i32, i32, i32) {
    %c0_i32 = arith.constant 0 : i32
    %c0_i32_0 = arith.constant 0 : i32
    %c0_i32_1 = arith.constant 0 : i32
    return %arg0, %arg1, %c0_i32, %c0_i32_0 : i32, i32, i32, i32
  }
}

</mosaic_0001>

<bundles_post_ra>
// kernel: tpu_custom_call.1
= control target key start
LH: loop header
LB: loop body
LE: loop exit
PB: predicated region body
PF: predicated region fallthrough
CT: control target
= control target key end

     0   :  { %9 = vsyncpa [#allocation5], 0  ;;  %s2483_s0 = inlined_call_operand.vmem [shape: f32[2,18,18,128], index: 0, kind: input, shape index: {}]   ;;  %s2484_s1 = inlined_call_operand.vmem [shape: f32[2,18,18,128], index: 1, kind: input, shape index: {}]   ;;  %s2485_s2 = inlined_call_operand.vmem [shape: f32[9,128], index: 2, kind: input, shape index: {}]   ;;  %s2486_s3 = inlined_call_operand.vmem [shape: bf16[128,128], index: 3, kind: input, shape index: {}]   ;;  %s2487_s4 = inlined_call_operand.hbm [shape: f32[2,16,16,128], index: 4, kind: output, shape index: {}]  }
   0x1   :  { %11 = vsyncpa [#allocation5 + $0x1], 0  ;;  %s1733_s15 = smov 0   ;;  %s1735_s16 = smov 0  }
   0x2   :  { %s1737_s17 = smov 0   ;;  %s1739_s18 = smov 0  }
   0x3   :  { %s1741_s19 = smov 0   ;;  %s1743_s20 = smov 0  }
   0x4   :  { %s1745_s21 = smov 0   ;;  %s1747_s22 = smov 0  }
   0x5 LB: > { %s1422_s23 = sadd.s32 4294967295, %s1703_s22   ;;  %s1423_s24 = sadd.s32 4294967294, %s1703_s22   ;;  %s1703_s22 = sphi %s1747_s22, %s17_s22   ;;  %s1699_s21 = sphi %s1745_s21, %s2571_s21   ;;  %s1695_s20 = sphi %s1743_s20, %s2570_s20   ;;  %s1691_s19 = sphi %s1741_s19, %s2569_s19   ;;  %s1687_s18 = sphi %s1739_s18, %s2568_s18   ;;  %s1683_s17 = sphi %s1737_s17, %s2567_s17   ;;  %s1679_s16 = sphi %s1735_s16, %s2566_s16   ;;  %s1675_s15 = sphi %s1733_s15, %s2565_s15  }
   0x6   : > { %s26_s25 = sadd.s32 1, %s1695_s20  ;;  %s29_s26 = sadd.s32 1, %s1699_s21 }
   0x7   : > { %p27_p0 = scmp.ge.s32.totalorder %s26_s25, 2  ;;  %p150_p1 = scmp.ne.s32.totalorder %s1683_s17, %s1679_s16 }
   0x8   : > { %p151_p2 = scmp.eq.s32.totalorder %s1422_s23, 3  ;;  %p156_p5 = scmp.ne.s32.totalorder %s1679_s16, %s1675_s15 }
   0x9   : > { %s2573_s25 = smov (%p27_p0, %s26_s25), 0  ;;  %s2575_s26 = smov (!%p27_p0, %s29_s26), %s1699_s21 }
   0xa   : > { %s136_s27 = ssub.s32 %s1695_s20, %s2573_s25  ;;  %p1784_p3 = por %p151_p2, %p150_p1 }
   0xb   : > { %p31_p4 = scmp.ge.s32.totalorder %s2575_s26, 2  ;;  %p157_p6 = scmp.eq.s32.totalorder %s1423_s24, 3 }
   0xc   : > { %p1428_p7 = scmp.ge.s32.totalorder %s1703_s22, 1  ;;  %p223_p9 = scmp.lt.s32.totalorder %s1703_s22, 5 }
   0xd   : > { %s2577_s26 = smov (%p31_p4, %s2575_s26), 0  ;;  %p1793_p8 = por %p157_p6, %p156_p5 }
   0xe   : > { %s135_s30 = ssub.s32 %s1699_s21, %s2577_s26  ;;  %s140_s5 = sadd.s32 1, %s1683_s17 }
   0xf   : > { %s137_s6 = sor.u32 %s136_s27, %s135_s30  ;;  %p224_p10 = pnand %p1428_p7, %p223_p9 }
  0x10   : > { %p138_p11 = scmp.eq.s32.totalorder %s137_s6, 0 }
  0x11   : > { %227 = sbr.rel (%p224_p10) target bundleno = 353 (0x161), region = 36 }
  0x12   : > { %s1802_s7 = scalar_select %p138_p11, %s1683_s17, %s140_s5  }
  0x18   : > { %v1601_v0 = vld [vmem:[%s2486_s3] sm:$0xff]   ;;  %s1808_s10 = sshll.u32 %s1687_s18, 3  ;;  %v1602_v1 = vld [vmem:[%s2486_s3 + $0x8] sm:$0xff]   ;;  %p277_p12 = scmp.lt.s32.totalorder %s1691_s19, 1  ;;  %v388_v2 = vlaneseq  ;;  %v1603_v3 = vld [vmem:[%s2486_s3 + $0x10] sm:$0xff]  }
  0x19   : > { %1477 = vmatprep.subr.bf16.mxu0 %v1601_v0  ;;  %1509 = vmatprep.subr.bf16.mxu1 %v1601_v0  ;;  %p279_p13 = scmp.lt.s32.totalorder %s1808_s10, 17  ;;  %v1604_v5 = vld [vmem:[%s2486_s3 + $0x18] sm:$0xff]   ;;  %v370_v6 = vld [vmem:[%s2485_s2] sm:$0xff]  ;;  %s1460_s12 = sadd.s32 8, %s1808_s10  ;;  %v1890_v34 = vld [vmem:[%s2486_s3 + $0x28] sm:$0xff]  }
  0x1a   : > { %1478 = vmatpush3.bf16.msra.mxu0 %v1601_v0  ;;  %1517 = vmatpush3.bf16.msra.mxu1 %v1601_v0  ;;  %s1816_s13 = scalar_select %p277_p12, %s1691_s19, 1  ;;  %v389_v4 = vshrl.u32 %v388_v2, 7  ;;  %v1841_v11 = vld [vmem:[%s2486_s3 + $0x20] sm:$0xff]   ;;  %v1984_v61 = vld [vmem:[%s2486_s3 + $0x30] sm:$0xff]   ;;  %v1989_v62 = vld [vmem:[%s2485_s2 + $0x8] ss:$0 sm:$0xff] }
  0x1b   : > { %1479 = vmatprep.subr.bf16.mxu0 %v1602_v1  ;;  %1510 = vmatprep.subr.bf16.mxu1 %v1602_v1  ;;  %s280_s24 = scalar_select %p279_p13, %s1808_s10, 17 }
  0x1c   : > { %s1526_s27 = smul.u32 54, %s1816_s13  ;;  %v390_v7 = vsub.s32 0, %v389_v4  ;;  %v442_v8 = vsub.s32 1, %v389_v4  ;;  %v526_v9 = vsub.s32 2, %v389_v4  ;;  %v611_v10 = vsub.s32 3, %v389_v4  ;;  %p1834_p0 = scmp.lt.s32.totalorder %s1460_s12, 17 }
  0x1d   : > { %s1525_s30 = smul.u32 3, %s280_s24  ;;  %v695_v12 = vsub.s32 4, %v389_v4  ;;  %v779_v13 = vsub.s32 5, %v389_v4  ;;  %v864_v14 = vsub.s32 6, %v389_v4  ;;  %v948_v15 = vsub.s32 7, %v389_v4  ;;  %s1458_s23 = sshll.u32 %s1687_s18, 4 }
  0x1e   : > { %1480 = vmatpush3.bf16.msra.mxu0 %v1602_v1  ;;  %1518 = vmatpush3.bf16.msra.mxu1 %v1602_v1  ;;  %v1851_v19 = vrot.slane %v370_v6, %v390_v7  ;;  %v1853_v20 = vrot.slane %v370_v6, %v442_v8  ;;  %v1858_v24 = vrot.slane %v370_v6, %v526_v9  ;;  %s2579_s12 = smov (!%p1834_p0, %s1460_s12), 17  ;;  %s1447_s24 = sshll.u32 %s1691_s19, 5 }
  0x1f   : > { %1481 = vmatprep.subr.bf16.mxu0 %v1603_v3  ;;  %1511 = vmatprep.subr.bf16.mxu1 %v1603_v3  ;;  %s283_s8 = sadd.s32 %s1526_s27, %s1525_s30  ;;  %v1860_v25 = vrot.slane %v370_v6, %v611_v10  ;;  %v1862_v26 = vrot.slane %v370_v6, %v695_v12  ;;  %v1883_v32 = vrot.slane %v370_v6, %v779_v13  ;;  %s1527_s11 = smul.u32 3, %s2579_s12 }
  0x20   : > { %s1431_s14 = sshll.u32 %s283_s8, 3  ;;  %2523 = vst [vmem:[#allocation7_spill] sm:$0xff] %v1851_v19  ;;  %v1885_v33 = vrot.slane %v370_v6, %v864_v14  ;;  %v1900_v37 = vrot.slane %v370_v6, %v948_v15  ;;  %s268_s8 = sand.u32 1, %s1679_s16  }
  0x21   : > { %s1846_s9 = scalar_lea.vmem %s2483_s0, %s1431_s14  ;;  %2524 = vst [vmem:[#allocation8_spill] sm:$0xff] %v1860_v25  ;;  %s2043_s30 = sadd.s32 %s1527_s11, %s1526_s27 }
  0x22   : > { %1482 = vmatpush3.bf16.msra.mxu0 %v1603_v3  ;;  %1519 = vmatpush3.bf16.msra.mxu1 %v1603_v3  ;;  %v309_v16 = vld [vmem:[%s1846_s9] sm:$0xff]  ;;  %v310_v17 = vld [vmem:[%s1846_s9 + $0x8] sm:$0xff]  ;;  %v311_v18 = vld [vmem:[%s1846_s9 + $0x10] sm:$0x3]  ;;  %s1434_s13 = sshll.u32 %s2043_s30, 3  ;;  %s1429_s11 = sshll.u32 %s268_s8, 7 }
  0x23   : > { %1483 = vmatprep.subr.bf16.mxu0 %v1604_v5  ;;  %1512 = vmatprep.subr.bf16.mxu1 %v1604_v5  ;;  %v312_v21 = vld [vmem:[%s1846_s9 + $0x18] sm:$0xff]  ;;  %v313_v22 = vld [vmem:[%s1846_s9 + $0x20] sm:$0xff]  ;;  %v314_v23 = vld [vmem:[%s1846_s9 + $0x28] sm:$0x3]  ;;  %333 = vst [vmem:[#allocation2] sm:$0xff] %v309_v16  ;;  %v1878_v30 = vmul.f32 %v1851_v19, %v309_v16  ;;  %v1881_v31 = vmul.f32 %v1851_v19, %v310_v17  ;;  %s2125_s10 = scalar_lea.vmem %s2484_s1, %s1434_s13  ;;  %s2401_s14 = scalar_lea.vmem [#allocation4], %s1429_s11 }
  0x24   : > { %334 = vst [vmem:[#allocation2 + $0x8] sm:$0xff] %v310_v17  ;;  %335 = vst [vmem:[#allocation2 + $0x10] sm:$0x3] %v311_v18  ;;  %v1871_v27 = vld [vmem:[%s1846_s9 + $0x30] sm:$0xff]  ;;  %v1874_v28 = vld [vmem:[%s1846_s9 + $0x38] sm:$0xff]  ;;  %v1895_v35 = vmul.f32 %v1860_v25, %v312_v21  ;;  %v1898_v36 = vmul.f32 %v1860_v25, %v313_v22  ;;  %v1910_v41 = vmul.f32 %v1851_v19, %v312_v21  ;;  %s1313_s5 = sadd.s32 %s1458_s23, %s1447_s24  ;;  %s1316_s13 = sshll.u32 %s2401_s14, 4  ;;  %s2424_s13 = int_to_ptr.vmem [resolvable:$true] %s1316_s13 }
  0x25   : > { %2525 = vst [vmem:[#allocation9_spill] sm:$0xff] %v1871_v27  ;;  %2526 = vst [vmem:[#allocation10_spill] sm:$0xff] %v1874_v28  ;;  %v317_v29 = vld [vmem:[%s1846_s9 + $0x40] sm:$0x3]  ;;  %v1906_v39 = vld [vmem:[%s1846_s9 + $0x68] sm:$0xff]  ;;  %v1914_v42 = vmul.f32 %v1885_v33, %v1871_v27  ;;  %v1918_v43 = vmul.f32 %v1885_v33, %v1874_v28  ;;  %v1930_v47 = vmul.f32 %v1851_v19, %v313_v22  ;;  %s1448_s30 = sshll.u32 %s1313_s5, 7 }
  0x26   : > { %336 = vst [vmem:[#allocation2 + $0x18] sm:$0xff] %v312_v21  ;;  %337 = vst [vmem:[#allocation2 + $0x20] sm:$0xff] %v313_v22  ;;  %v1903_v38 = vld [vmem:[%s1846_s9 + $0x60] sm:$0xff]  ;;  %v323_v40 = vld [vmem:[%s1846_s9 + $0x70] sm:$0x3]  ;;  %1484 = vmatpush3.bf16.msra.mxu0 %v1604_v5  ;;  %1520 = vmatpush3.bf16.msra.mxu1 %v1604_v5  ;;  %v1949_v52 = vmul.f32 %v1851_v19, %v1906_v39  ;;  %v1979_v60 = vmul.f32 %v1860_v25, %v1871_v27  ;;  %s2422_s18 = scalar_lea.hbm %s2487_s4, %s1448_s30  ;;  %s2431_s19 = scalar_lea.sflag [#allocation5], %s268_s8 }
  0x27   : > { %338 = vst [vmem:[#allocation2 + $0x28] sm:$0x3] %v314_v23  ;;  %339 = vst [vmem:[#allocation2 + $0x30] sm:$0xff] %v1871_v27  ;;  %v1921_v44 = vld [vmem:[%s1846_s9 + $0x78] sm:$0xff]  ;;  %v1924_v45 = vld [vmem:[%s1846_s9 + $0x80] sm:$0xff]  ;;  %1485 = vmatprep.subr.bf16.mxu0 %v1841_v11  ;;  %1513 = vmatprep.subr.bf16.mxu1 %v1841_v11  ;;  %v1945_v51 = vmul.f32 %v1851_v19, %v1903_v38  ;;  %v1995_v63 = vmul.f32 %v1860_v25, %v1874_v28  ;;  %s1609_s6 = scalar_lea.vmem %s2424_s13, 2048 }
  0x28   : > { %340 = vst [vmem:[#allocation2 + $0x38] sm:$0xff] %v1874_v28  ;;  %341 = vst [vmem:[#allocation2 + $0x40] sm:$0x3] %v317_v29  ;;  %v326_v46 = vld [vmem:[%s1846_s9 + $0x88] sm:$0x3]  ;;  %v1935_v48 = vld [vmem:[%s1846_s9 + $0x90] sm:$0xff]  ;;  %v1953_v53 = vmul.f32 %v1860_v25, %v1921_v44  ;;  %v1960_v54 = vmul.f32 %v1860_v25, %v1924_v45  ;;  %v2014_v5 = vmul.f32 %v1851_v19, %v1921_v44  ;;  %p1610_p1 = scmp.ne.s32.totalorder %s2424_s13, %s1609_s6 }
  0x29   : > { %2527 = vst [vmem:[#allocation11_spill] sm:$0xff] %v1903_v38  ;;  %2528 = vst [vmem:[#allocation12_spill] sm:$0xff] %v1906_v39  ;;  %v1938_v49 = vld [vmem:[%s1846_s9 + $0x98] sm:$0xff]  ;;  %v329_v50 = vld [vmem:[%s1846_s9 + $0xa0] sm:$0x3]  ;;  %v1964_v55 = vmul.f32 %v1885_v33, %v1935_v48  ;;  %v2022_v9 = vmul.f32 %v1851_v19, %v1924_v45  ;;  %v2026_v10 = vmul.f32 %v1860_v25, %v1935_v48 }
  0x2a   : > { %2529 = vst [vmem:[#allocation13_spill] sm:$0xff] %v1921_v44  ;;  %2530 = vst [vmem:[#allocation14_spill] sm:$0xff] %v1924_v45  ;;  %v1968_v56 = vmul.f32 %v1885_v33, %v1938_v49  ;;  %v1971_v57 = vld [vmem:[%s1846_s9 + $0x48] sm:$0xff]  ;;  %v1974_v58 = vld [vmem:[%s1846_s9 + $0x50] sm:$0xff]  ;;  %1486 = vmatpush3.bf16.msra.mxu0 %v1841_v11  ;;  %1521 = vmatpush3.bf16.msra.mxu1 %v1841_v11  ;;  %v2030_v11 = vmul.f32 %v1860_v25, %v1938_v49  ;;  %p1611_p2 = pnand %p1610_p1, %p1784_p3 }
  0x2b   : > { %345 = vst [vmem:[#allocation2 + $0x60] sm:$0xff] %v1903_v38  ;;  %346 = vst [vmem:[#allocation2 + $0x68] sm:$0xff] %v1906_v39  ;;  %v320_v59 = vld [vmem:[%s1846_s9 + $0x58] sm:$0x3]  ;;  %v1999_v0 = vmul.f32 %v1885_v33, %v1971_v57  ;;  %v2003_v1 = vmul.f32 %v1885_v33, %v1974_v58  ;;  %v2006_v2 = vld [vmem:[%s1846_s9 + $0xa8] sm:$0xff]  ;;  %1487 = vmatprep.subr.bf16.mxu0 %v1890_v34  ;;  %1514 = vmatprep.subr.bf16.mxu1 %v1890_v34 }
  0x2c   : > { %347 = vst [vmem:[#allocation2 + $0x70] sm:$0x3] %v323_v40  ;;  %2531 = vst [vmem:[#allocation15_spill] sm:$0xff] %v1935_v48  ;;  %v2009_v3 = vld [vmem:[%s1846_s9 + $0xb0] sm:$0xff]  ;;  %v332_v4 = vld [vmem:[%s1846_s9 + $0xb8] sm:$0x3]  ;;  %p1612_p4 = pneg %p1611_p2 }
  0x2d   : > { %2532 = vst [vmem:[#allocation16_spill] sm:$0xff] %v1938_v49  ;;  %348 = vst [vmem:[#allocation2 + $0x78] sm:$0xff] %v1921_v44  ;;  %v424_v6 = vld [vmem:[#allocation2 + $0x1] sm:$0xff]  ;;  %v425_v7 = vld [vmem:[#allocation2 + $0x9] sm:$0xff]  ;;  %s1705_s9 = smov [#allocation4]  }
  0x2e   : > { %349 = vst [vmem:[#allocation2 + $0x80] sm:$0xff] %v1924_v45  ;;  %350 = vst [vmem:[#allocation2 + $0x88] sm:$0x3] %v326_v46  ;;  %v508_v8 = vld [vmem:[#allocation2 + $0x2] sm:$0xff]  ;;  %v444_v12 = vmul.f32 %v1853_v20, %v424_v6  ;;  %v445_v13 = vmul.f32 %v1853_v20, %v425_v7  ;;  %v509_v14 = vld [vmem:[#allocation2 + $0xa] sm:$0xff]  ;;  %1488 = vmatpush3.bf16.msra.mxu0 %v1890_v34  ;;  %1522 = vmatpush3.bf16.msra.mxu1 %v1890_v34 }
  0x2f   : > { %351 = vst [vmem:[#allocation2 + $0x90] sm:$0xff] %v1935_v48  ;;  %352 = vst [vmem:[#allocation2 + $0x98] sm:$0xff] %v1938_v49  ;;  %v528_v15 = vmul.f32 %v1858_v24, %v508_v8  ;;  %v677_v16 = vld [vmem:[#allocation2 + $0x19] sm:$0xff]  ;;  %v2037_v17 = vld [vmem:[#allocation2 + $0x21] sm:$0xff]  ;;  %v529_v18 = vmul.f32 %v1858_v24, %v509_v14  ;;  %1489 = vmatprep.subr.bf16.mxu0 %v1984_v61  ;;  %1515 = vmatprep.subr.bf16.mxu1 %v1984_v61 }
  0x30   : > { %353 = vst [vmem:[#allocation2 + $0xa0] sm:$0x3] %v329_v50  ;;  %2533 = vst [vmem:[#allocation17_spill] sm:$0xff] %v1971_v57  ;;  %v697_v21 = vmul.f32 %v1862_v26, %v677_v16  ;;  %v698_v22 = vmul.f32 %v1862_v26, %v2037_v17  ;;  %v2049_v23 = vld [vmem:[#allocation2 + $0x1a] sm:$0xff]  ;;  %v2051_v29 = vld [vmem:[#allocation2 + $0x22] sm:$0xff]  ;;  %v2056_v46 = vmul.f32 %v677_v16, %v1853_v20 }
  0x31   : > { %2534 = vst [vmem:[#allocation18_spill] sm:$0xff] %v1974_v58  ;;  %342 = vst [vmem:[#allocation2 + $0x48] sm:$0xff] %v1971_v57  ;;  %v2053_v40 = vld [vmem:[#allocation2 + $0x31] sm:$0xff]  ;;  %v476_v50 = vadd.f32 %v444_v12, %v1878_v30  ;;  %v782_v6 = vmul.f32 %v1883_v32, %v2051_v29  ;;  %v2064_v7 = vld [vmem:[#allocation2 + $0x39] sm:$0xff] }
  0x32   : > { %343 = vst [vmem:[#allocation2 + $0x50] sm:$0xff] %v1974_v58  ;;  %344 = vst [vmem:[#allocation2 + $0x58] sm:$0x3] %v320_v59  ;;  %v477_v59 = vadd.f32 %v445_v13, %v1881_v31  ;;  %v2066_v8 = vld [vmem:[#allocation2 + $0x32] sm:$0xff]  ;;  %v2068_v14 = vld [vmem:[#allocation2 + $0x3a] sm:$0xff]  ;;  %v2074_v30 = vmul.f32 %v1900_v37, %v2053_v40  ;;  %v2078_v31 = vmul.f32 %v1900_v37, %v2064_v7  ;;  %1490 = vmatpush3.bf16.msra.mxu0 %v1984_v61 }
  0x33   : > { %2535 = vst [vmem:[#allocation19_spill] sm:$0xff] %v2009_v3  ;;  %354 = vst [vmem:[#allocation2 + $0xa8] sm:$0xff] %v2006_v2  ;;  %v2082_v12 = vmul.f32 %v1989_v62, %v2066_v8  ;;  %v2084_v13 = vld [vmem:[#allocation2 + $0x61] sm:$0xff]  ;;  %v2086_v16 = vld [vmem:[#allocation2 + $0x69] sm:$0xff]  ;;  %v560_v44 = vadd.f32 %v528_v15, %v476_v50  ;;  %v2098_v48 = vmul.f32 %v1989_v62, %v2068_v14  ;;  %1523 = vmatpush3.bf16.msra.mxu1 %v1984_v61 }
  0x34   : > { %355 = vst [vmem:[#allocation2 + $0xb0] sm:$0xff] %v2009_v3  ;;  %356 = vst [vmem:[#allocation2 + $0xb8] sm:$0x3] %v332_v4  ;;  %v781_v4 = vmul.f32 %v1883_v32, %v2049_v23  ;;  %v2088_v45 = vld [vmem:[#allocation2 + $0x62] sm:$0xff]  ;;  %v1608_v34 = vld [vmem:[%s2486_s3 + $0x38] sm:$0xff]   ;;  %v561_v49 = vadd.f32 %v529_v18, %v477_v59  ;;  %v452_v38 = vmul.f32 %v1853_v20, %v2084_v13 }
  0x35   : > { %2536 = vst [vmem:[#allocation20_spill] sm:$0xff] %v2026_v10  ;;  %2537 = vst [vmem:[#allocation21_spill] sm:$0xff] %v2030_v11  ;;  %v2100_v39 = vld [vmem:[#allocation2 + $0x6a] sm:$0xff]  ;;  %v453_v58 = vmul.f32 %v1853_v20, %v2086_v16  ;;  %v536_v25 = vmul.f32 %v1858_v24, %v2088_v45  ;;  %v2110_v15 = vld [vmem:[#allocation2 + $0x79] sm:$0xff]  ;;  %v645_v50 = vadd.f32 %v1895_v35, %v560_v44  ;;  %1491 = vmatprep.subr.bf16.mxu0 %v1608_v34 }
  0x36   : > { %2538 = vst [vmem:[#allocation22_spill] sm:$0xff] %v2084_v13  ;;  %2539 = vst [vmem:[#allocation23_spill] sm:$0xff] %v2086_v16  ;;  %v537_v57 = vmul.f32 %v1858_v24, %v2100_v39  ;;  %v2112_v18 = vld [vmem:[#allocation2 + $0x81] sm:$0xff]  ;;  %v646_v59 = vadd.f32 %v1898_v36, %v561_v49  ;;  %v705_v13 = vmul.f32 %v1862_v26, %v2110_v15  ;;  %1516 = vmatprep.subr.bf16.mxu1 %v1608_v34  ;;  %v2137_v61 = vld [vmem:[#allocation2 + $0x91] sm:$0xff] }
  0x37   : > { %2540 = vst [vmem:[#allocation24_spill] sm:$0xff] %v2088_v45  ;;  %2541 = vst [vmem:[#allocation25_spill] sm:$0xff] %v2100_v39  ;;  %v706_v16 = vmul.f32 %v1862_v26, %v2112_v18  ;;  %v2120_v28 = vld [vmem:[#allocation2 + $0x7a] sm:$0xff]  ;;  %v484_v35 = vadd.f32 %v452_v38, %v1945_v51  ;;  %v485_v36 = vadd.f32 %v453_v58, %v1949_v52  ;;  %v2131_v44 = vld [vmem:[#allocation2 + $0x82] sm:$0xff]  ;;  %1492 = vmatpush3.bf16.msra.mxu0 %v1608_v34 }
  0x38   : > { %v789_v49 = vmul.f32 %v1883_v32, %v2120_v28  ;;  %v729_v39 = vadd.f32 %v697_v21, %v645_v50  ;;  %v730_v45 = vadd.f32 %v698_v22, %v646_v59  ;;  %v790_v19 = vmul.f32 %v1883_v32, %v2131_v44  ;;  %v2139_v38 = vld [vmem:[#allocation2 + $0x99] sm:$0xff]  ;;  %1524 = vmatpush3.bf16.msra.mxu1 %v1608_v34 }
  0x39   : > { %v568_v51 = vadd.f32 %v536_v25, %v484_v35  ;;  %v569_v52 = vadd.f32 %v537_v57, %v485_v36  ;;  %v958_v58 = vmul.f32 %v1900_v37, %v2137_v61  ;;  %v959_v27 = vmul.f32 %v1900_v37, %v2139_v38  ;;  %v2145_v21 = vld [vmem:[#allocation2 + $0x92] sm:$0xff]  ;;  %v2147_v22 = vld [vmem:[#allocation2 + $0x9a] sm:$0xff]  ;;  %v2157_v35 = vld [vmem:[%s2125_s10 + $0x8] sm:$0xff] }
  0x3a   : > { %2542 = vst [vmem:[#allocation26_spill] sm:$0xff] %v2147_v22  ;;  %v2150_v50 = vld [vmem:[%s2125_s10] sm:$0xff]  ;;  %v813_v59 = vadd.f32 %v781_v4, %v729_v39  ;;  %v814_v11 = vadd.f32 %v782_v6, %v730_v45  ;;  %v1042_v25 = vmul.f32 %v1989_v62, %v2145_v21  ;;  %v1043_v57 = vmul.f32 %v1989_v62, %v2147_v22  ;;  %v359_v36 = vld [vmem:[%s2125_s10 + $0x10] sm:$0x3]  ;;  %v2162_v10 = vld [vmem:[%s2125_s10 + $0x18] sm:$0xff] }
  0x3b   : > { %2543 = vst [vmem:[#allocation27_spill] sm:$0xff] %v2150_v50  ;;  %364 = vst [vmem:[#allocation2 + $0xc0] sm:$0xff] %v2150_v50  ;;  %v653_v3 = vadd.f32 %v1953_v53, %v568_v51  ;;  %v654_v39 = vadd.f32 %v1960_v54, %v569_v52  ;;  %v447_v45 = vmul.f32 %v2037_v17, %v1853_v20  ;;  %v2170_v4 = vld [vmem:[%s2125_s10 + $0x20] sm:$0xff]  ;;  %v362_v6 = vld [vmem:[%s2125_s10 + $0x28] sm:$0x3]  ;;  %s1613_s10 = sshll.u32 %s1705_s9, 4  ;;  %s1614_s10 = int_to_ptr.vmem [resolvable:$false] %s1613_s10 }
  0x3c   : > { %365 = vst [vmem:[#allocation2 + $0xc8] sm:$0xff] %v2157_v35  ;;  %366 = vst [vmem:[#allocation2 + $0xd0] sm:$0x3] %v359_v36  ;;  %v898_v50 = vadd.f32 %v1914_v42, %v813_v59  ;;  %v899_v22 = vadd.f32 %v1918_v43, %v814_v11  ;;  %v478_v53 = vadd.f32 %v2056_v46, %v1910_v41  ;;  %v2202_v36 = vld [vmem:[#allocation2 + $0x51] sm:$0xff]  ;;  %s1615_s11 = scalar_lea.vmem %s1614_s10, 4096  ;;  %p1616_p5 = scmp.lt.s32.totalorder %s2424_s13, %s1614_s10 }
  0x3d   : > { %367 = vst [vmem:[#allocation2 + $0xd8] sm:$0xff] %v2162_v10  ;;  %v530_v54 = vmul.f32 %v2049_v23, %v1858_v24  ;;  %368 = vst [vmem:[#allocation2 + $0xe0] sm:$0xff] %v2170_v4  ;;  %v737_v17 = vadd.f32 %v705_v13, %v653_v3  ;;  %v738_v34 = vadd.f32 %v706_v16, %v654_v39  ;;  %p1617_p6 = scmp.lt.s32.totalorder %s1615_s11, %s1609_s6 }
  0x3e   : > { %369 = vst [vmem:[#allocation2 + $0xe8] sm:$0x3] %v362_v6  ;;  %v479_v51 = vadd.f32 %v447_v45, %v1930_v47  ;;  %v531_v52 = vmul.f32 %v2051_v29, %v1858_v24  ;;  %v982_v42 = vadd.f32 %v2074_v30, %v898_v50  ;;  %v983_v43 = vadd.f32 %v2078_v31, %v899_v22  ;;  %v2200_v22 = vld [vmem:[#allocation2 + $0x49] sm:$0xff] }
  0x3f   : > { %v562_v11 = vadd.f32 %v530_v54, %v478_v53  ;;  %v699_v41 = vmul.f32 %v2053_v40, %v1862_v26  ;;  %v821_v46 = vadd.f32 %v789_v49, %v737_v17  ;;  %v822_v23 = vadd.f32 %v790_v19, %v738_v34  ;;  %v2210_v45 = vld [vmem:[#allocation2 + $0x4a] sm:$0xff]  ;;  %p1618_p7 = por %p1617_p6, %p1616_p5 }
  0x40   : > { %v563_v59 = vadd.f32 %v531_v52, %v479_v51  ;;  %v700_v3 = vmul.f32 %v2064_v7, %v1862_v26  ;;  %v1066_v13 = vadd.f32 %v2082_v12, %v982_v42  ;;  %v1067_v47 = vadd.f32 %v2098_v48, %v983_v43  ;;  %v2221_v42 = vld [vmem:[#allocation2 + $0x52] sm:$0xff] }
  0x41   : > { %v647_v29 = vadd.f32 %v1979_v60, %v562_v11  ;;  %v783_v30 = vmul.f32 %v2066_v8, %v1883_v32  ;;  %v906_v31 = vadd.f32 %v1964_v55, %v821_v46  ;;  %v907_v16 = vadd.f32 %v1968_v56, %v822_v23  ;;  %p1619_p9 = pnand %p1618_p7, %p1612_p4 }
  0x42   : > { %v648_v49 = vadd.f32 %v1995_v63, %v563_v59  ;;  %v784_v19 = vmul.f32 %v2068_v14, %v1883_v32  ;;  %v1114_v50 = vpack.c.bf16 %v1067_v47, %v1066_v13  ;;  %v952_v48 = vmul.f32 %v1900_v37, %v2200_v22  ;;  %v2544_v47 = vld [vmem:[#allocation26_spill] sm:$0xff] }
  0x43   : > { %v731_v12 = vadd.f32 %v699_v41, %v647_v29  ;;  %v876_v60 = vmul.f32 %v1885_v33, %v2006_v2  ;;  %v990_v55 = vadd.f32 %v958_v58, %v906_v31  ;;  %v991_v39 = vadd.f32 %v959_v27, %v907_v16  ;;  %v2545_v29 = vld [vmem:[#allocation19_spill] sm:$0xff] }
  0x44   : > { %v732_v56 = vadd.f32 %v700_v3, %v648_v49  ;;  %v953_v63 = vmul.f32 %v1900_v37, %v2202_v36  ;;  %1493 = vmatprep.mubr.bf16.mxu0 %v1114_v50  ;;  %v1036_v53 = vmul.f32 %v1989_v62, %v2210_v45  ;;  %v454_v54 = vmul.f32 %v2110_v15, %v1853_v20  ;;  %v2240_v31 = vld [vmem:[#allocation2 + $0xa9] sm:$0xff]  ;;  %v2546_v49 = vld [vmem:[#allocation20_spill] sm:$0xff]  ;;  %v2547_v50 = vld [vmem:[#allocation21_spill] sm:$0xff] }
  0x45   : > { %v815_v6 = vadd.f32 %v783_v30, %v731_v12  ;;  %v455_v17 = vmul.f32 %v2112_v18, %v1853_v20  ;;  %v1074_v34 = vadd.f32 %v1042_v25, %v990_v55  ;;  %v1075_v58 = vadd.f32 %v1043_v57, %v991_v39  ;;  %v2248_v39 = vld [vmem:[#allocation2 + $0xaa] sm:$0xff] }
  0x46   : > { %v816_v27 = vadd.f32 %v784_v19, %v732_v56  ;;  %v538_v51 = vmul.f32 %v2120_v28, %v1858_v24  ;;  %v486_v43 = vadd.f32 %v454_v54, %v2014_v5  ;;  %v539_v41 = vmul.f32 %v2131_v44, %v1858_v24  ;;  %v2548_v54 = vld [vmem:[#allocation9_spill] sm:$0xff] }
  0x47   : > { %v900_v52 = vadd.f32 %v1999_v0, %v815_v6  ;;  %v487_v11 = vadd.f32 %v455_v17, %v2022_v9  ;;  %v1118_v46 = vpack.c.bf16 %v1075_v58, %v1074_v34  ;;  %v1037_v25 = vmul.f32 %v1989_v62, %v2221_v42 }
  0x48   : > { %v901_v23 = vadd.f32 %v2003_v1, %v816_v27  ;;  %v707_v57 = vmul.f32 %v2137_v61, %v1862_v26  ;;  %v570_v0 = vadd.f32 %v538_v51, %v486_v43  ;;  %v708_v5 = vmul.f32 %v2139_v38, %v1862_v26  ;;  %v2550_v27 = vld [vmem:[#allocation10_spill] sm:$0xff] }
  0x49   : > { %v984_v59 = vadd.f32 %v952_v48, %v900_v52  ;;  %v571_v3 = vadd.f32 %v539_v41, %v487_v11  ;;  %1501 = vmatprep.mubr.bf16.mxu1 %v1118_v46  ;;  %v791_v13 = vmul.f32 %v2145_v21, %v1883_v32  ;;  %v792_v1 = vmul.f32 %v2544_v47, %v1883_v32  ;;  %v2244_v48 = vld [vmem:[#allocation2 + $0xb1] sm:$0xff] }
  0x4a   : > { %v985_v9 = vadd.f32 %v953_v63, %v901_v23  ;;  %v877_v30 = vmul.f32 %v1885_v33, %v2545_v29  ;;  %v655_v19 = vadd.f32 %v2546_v49, %v570_v0  ;;  %v960_v55 = vmul.f32 %v1900_v37, %v2240_v31  ;;  %v2551_v0 = vld [vmem:[#allocation17_spill] sm:$0xff] }
  0x4b   : > { %v1068_v16 = vadd.f32 %v1036_v53, %v984_v59  ;;  %v656_v12 = vadd.f32 %v2547_v50, %v571_v3  ;;  %v961_v63 = vmul.f32 %v1900_v37, %v2244_v48  ;;  %v1044_v6 = vmul.f32 %v1989_v62, %v2248_v39  ;;  %v2549_v53 = vld [vmem:[#allocation7_spill] sm:$0xff]  ;;  %v2552_v3 = vld [vmem:[#allocation8_spill] sm:$0xff] }
  0x4c   : > { %v1069_v56 = vadd.f32 %v1037_v25, %v985_v9  ;;  %v396_v17 = vmul.f32 %v2549_v53, %v2548_v54  ;;  %v739_v34 = vadd.f32 %v707_v57, %v655_v19  ;;  %v397_v51 = vmul.f32 %v2549_v53, %v2550_v27  ;;  %v2266_v57 = vld [vmem:[#allocation2 + $0xb2] sm:$0xff] }
  0x4d   : > { %v740_v58 = vadd.f32 %v708_v5, %v656_v12  ;;  %v448_v52 = vmul.f32 %v2053_v40, %v1853_v20  ;;  %v449_v11 = vmul.f32 %v2064_v7, %v1853_v20  ;;  %v532_v41 = vmul.f32 %v2066_v8, %v1858_v24  ;;  %v2553_v7 = vld [vmem:[#allocation18_spill] sm:$0xff]  ;;  %v2555_v27 = vld [vmem:[#allocation12_spill] sm:$0xff] }
  0x4e   : > { %v1115_v43 = vpack.c.bf16 %v1069_v56, %v1068_v16  ;;  %v533_v46 = vmul.f32 %v2068_v14, %v1858_v24  ;;  %v823_v23 = vadd.f32 %v791_v13, %v739_v34  ;;  %v617_v5 = vmul.f32 %v2552_v3, %v2551_v0  ;;  %v2554_v56 = vld [vmem:[#allocation11_spill] sm:$0xff] }
  0x4f   : > { %v824_v25 = vadd.f32 %v792_v1, %v740_v58  ;;  %v480_v59 = vadd.f32 %v448_v52, %v396_v17  ;;  %v1045_v40 = vmul.f32 %v1989_v62, %v2266_v57  ;;  %v481_v9 = vadd.f32 %v449_v11, %v397_v51  ;;  %v2556_v51 = vld [vmem:[#allocation22_spill] sm:$0xff] }
  0x50   : > { %1494 = vmatmul.mubr.bf16.vlgmr.msra.gmra.mrb[0].mxu0 %v1115_v43  ;;  %v618_v16 = vmul.f32 %v2552_v3, %v2553_v7  ;;  %v701_v8 = vmul.f32 %v2200_v22, %v1862_v26  ;;  %v908_v14 = vadd.f32 %v876_v60, %v823_v23  ;;  %v702_v49 = vmul.f32 %v2202_v36, %v1862_v26  ;;  %v2557_v43 = vld [vmem:[#allocation23_spill] sm:$0xff] }
  0x51   : > { %v909_v13 = vadd.f32 %v877_v30, %v824_v25  ;;  %v564_v1 = vadd.f32 %v532_v41, %v480_v59  ;;  %v565_v19 = vadd.f32 %v533_v46, %v481_v9  ;;  %v785_v50 = vmul.f32 %v2210_v45, %v1883_v32  ;;  %v2558_v41 = vld [vmem:[#allocation24_spill] sm:$0xff]  ;;  %v2559_v9 = vld [vmem:[#allocation15_spill] sm:$0xff] }
  0x52   : > { %v786_v12 = vmul.f32 %v2221_v42, %v1883_v32  ;;  %v870_v54 = vmul.f32 %v1885_v33, %v2554_v56  ;;  %v992_v17 = vadd.f32 %v960_v55, %v908_v14  ;;  %v871_v60 = vmul.f32 %v1885_v33, %v2555_v27 }
  0x53   : > { %v993_v34 = vadd.f32 %v961_v63, %v909_v13  ;;  %v649_v58 = vadd.f32 %v617_v5, %v564_v1  ;;  %v650_v30 = vadd.f32 %v618_v16, %v565_v19  ;;  %v954_v52 = vmul.f32 %v1900_v37, %v2556_v51  ;;  %v2560_v5 = vld [vmem:[#allocation16_spill] sm:$0xff] }
  0x54   : > { %v955_v11 = vmul.f32 %v1900_v37, %v2557_v43  ;;  %v1038_v46 = vmul.f32 %v1989_v62, %v2558_v41  ;;  %v1076_v23 = vadd.f32 %v1044_v6, %v992_v17  ;;  %v404_v55 = vmul.f32 %v2549_v53, %v2559_v9 }
  0x55   : > { %v1077_v25 = vadd.f32 %v1045_v40, %v993_v34  ;;  %v733_v59 = vadd.f32 %v701_v8, %v649_v58  ;;  %v734_v63 = vadd.f32 %v702_v49, %v650_v30  ;;  %v405_v14 = vmul.f32 %v2549_v53, %v2560_v5  ;;  %v2562_v5 = vld [vmem:[#allocation27_spill] sm:$0xff] }
  0x56   : > { %v456_v16 = vmul.f32 %v2137_v61, %v1853_v20  ;;  %v457_v13 = vmul.f32 %v2139_v38, %v1853_v20  ;;  %v540_v6 = vmul.f32 %v2145_v21, %v1858_v24  ;;  %v541_v40 = vmul.f32 %v2544_v47, %v1858_v24  ;;  %v2561_v61 = vld [vmem:[#allocation25_spill] sm:$0xff] }
  0x57   : > { %v1119_v1 = vpack.c.bf16 %v1077_v25, %v1076_v23  ;;  %v817_v19 = vadd.f32 %v785_v50, %v733_v59  ;;  %v818_v8 = vadd.f32 %v786_v12, %v734_v63  ;;  %v625_v34 = vmul.f32 %v2552_v3, %v2006_v2 }
  0x58   : > { %v488_v17 = vadd.f32 %v456_v16, %v404_v55  ;;  %v489_v49 = vadd.f32 %v457_v13, %v405_v14  ;;  %v1039_v30 = vmul.f32 %v1989_v62, %v2561_v61  ;;  %v626_v38 = vmul.f32 %v2552_v3, %v2545_v29  ;;  %v2320_v16 = vld [vmem:[#allocation2 + $0xc1] sm:$0xff] }
  0x59   : > { %1502 = vmatmul.mubr.bf16.vlgmr.msra.gmra.mrb[0].mxu1 %v1119_v1  ;;  %v902_v58 = vadd.f32 %v870_v54, %v817_v19  ;;  %v709_v21 = vmul.f32 %v2240_v31, %v1862_v26  ;;  %v903_v50 = vadd.f32 %v871_v60, %v818_v8  ;;  %v710_v12 = vmul.f32 %v2244_v48, %v1862_v26  ;;  %v2322_v60 = vld [vmem:[#allocation2 + $0xc9] sm:$0xff] }
  0x5a   : > { %v572_v23 = vadd.f32 %v540_v6, %v488_v17  ;;  %v573_v47 = vadd.f32 %v541_v40, %v489_v49  ;;  %v793_v59 = vmul.f32 %v2248_v39, %v1883_v32  ;;  %v794_v54 = vmul.f32 %v2266_v57, %v1883_v32 }
  0x5b   : > { %v986_v25 = vadd.f32 %v954_v52, %v902_v58  ;;  %v987_v9 = vadd.f32 %v955_v11, %v903_v50  ;;  %v878_v14 = vmul.f32 %v1885_v33, %v2562_v5  ;;  %v879_v52 = vmul.f32 %v1885_v33, %v2157_v35  ;;  %v1026_v50 = vld [vmem:[#allocation2 + $0xc2] sm:$0xff] }
  0x5c   : > { %v657_v55 = vadd.f32 %v625_v34, %v572_v23  ;;  %v658_v63 = vadd.f32 %v626_v38, %v573_v47  ;;  %v962_v1 = vmul.f32 %v1900_v37, %v2320_v16  ;;  %v963_v19 = vmul.f32 %v1900_v37, %v2322_v60 }
  0x5d   : > { %v1070_v13 = vadd.f32 %v1038_v46, %v986_v25  ;;  %v1071_v11 = vadd.f32 %v1039_v30, %v987_v9  ;;  %v398_v8 = vmul.f32 %v2549_v53, %v2551_v0  ;;  %v399_v17 = vmul.f32 %v2549_v53, %v2553_v7  ;;  %v1027_v0 = vld [vmem:[#allocation2 + $0xca] sm:$0xff] }
  0x5e   : > { %v741_v6 = vadd.f32 %v709_v21, %v657_v55  ;;  %v742_v40 = vadd.f32 %v710_v12, %v658_v63  ;;  %v450_v46 = vmul.f32 %v2200_v22, %v1853_v20  ;;  %v451_v49 = vmul.f32 %v2202_v36, %v1853_v20 }
  0x5f   : > { %v534_v34 = vmul.f32 %v2210_v45, %v1858_v24  ;;  %v1116_v58 = vpack.c.bf16 %v1071_v11, %v1070_v13  ;;  %v535_v21 = vmul.f32 %v2221_v42, %v1858_v24  ;;  %v619_v7 = vmul.f32 %v2552_v3, %v2554_v56 }
  0x60   : > { %v825_v38 = vadd.f32 %v793_v59, %v741_v6  ;;  %v826_v30 = vadd.f32 %v794_v54, %v742_v40  ;;  %v482_v23 = vadd.f32 %v450_v46, %v398_v8  ;;  %v483_v47 = vadd.f32 %v451_v49, %v399_v17  ;;  %v2564_v8 = vld [vmem:[#allocation14_spill] sm:$0xff] }
  0x61   : > { %v620_v22 = vmul.f32 %v2552_v3, %v2555_v27  ;;  %1497 = vmatprep.mubr.bf16.mxu0 %v1116_v58  ;;  %v1046_v45 = vmul.f32 %v1989_v62, %v1026_v50  ;;  %v1047_v25 = vmul.f32 %v1989_v62, %v1027_v0  ;;  %v703_v42 = vmul.f32 %v1862_v26, %v2556_v51 }
  0x62   : > { %v910_v36 = vadd.f32 %v878_v14, %v825_v38  ;;  %v911_v12 = vadd.f32 %v879_v52, %v826_v30  ;;  %v566_v59 = vadd.f32 %v534_v34, %v482_v23  ;;  %v567_v54 = vadd.f32 %v535_v21, %v483_v47  ;;  %v2563_v52 = vld [vmem:[#allocation13_spill] sm:$0xff] }
  0x63   : > { %v704_v9 = vmul.f32 %v1862_v26, %v2557_v43  ;;  %v787_v27 = vmul.f32 %v1883_v32, %v2558_v41  ;;  %v788_v13 = vmul.f32 %v1883_v32, %v2561_v61  ;;  %v872_v11 = vmul.f32 %v1885_v33, %v2563_v52 }
  0x64   : > { %v994_v55 = vadd.f32 %v962_v1, %v910_v36  ;;  %v995_v56 = vadd.f32 %v963_v19, %v911_v12  ;;  %v651_v63 = vadd.f32 %v619_v7, %v566_v59  ;;  %v652_v14 = vadd.f32 %v620_v22, %v567_v54  ;;  %v944_v12 = vld [vmem:[#allocation2 + $0xd9] sm:$0xff]  ;;  %v1029_v54 = vld [vmem:[#allocation2 + $0xe2] sm:$0xff] }
  0x65   : > { %v873_v51 = vmul.f32 %v1885_v33, %v2564_v8  ;;  %v956_v43 = vmul.f32 %v1900_v37, %v2110_v15  ;;  %v406_v41 = vmul.f32 %v2549_v53, %v2006_v2  ;;  %v407_v17 = vmul.f32 %v2549_v53, %v2545_v29  ;;  %v1028_v59 = vld [vmem:[#allocation2 + $0xda] sm:$0xff] }
  0x66   : > { %v1078_v6 = vadd.f32 %v1046_v45, %v994_v55  ;;  %v1079_v40 = vadd.f32 %v1047_v25, %v995_v56  ;;  %v735_v1 = vadd.f32 %v703_v42, %v651_v63  ;;  %v736_v19 = vadd.f32 %v704_v9, %v652_v14 }
  0x67   : > { %v458_v46 = vmul.f32 %v2240_v31, %v1853_v20  ;;  %v459_v49 = vmul.f32 %v2244_v48, %v1853_v20  ;;  %v542_v34 = vmul.f32 %v2248_v39, %v1858_v24  ;;  %v957_v38 = vmul.f32 %v1900_v37, %v2112_v18 }
  0x68   : > { %v1120_v61 = vpack.c.bf16 %v1079_v40, %v1078_v6  ;;  %v819_v58 = vadd.f32 %v787_v27, %v735_v1  ;;  %v820_v15 = vadd.f32 %v788_v13, %v736_v19  ;;  %v543_v2 = vmul.f32 %v2266_v57, %v1858_v24 }
  0x69   : > { %v490_v29 = vadd.f32 %v458_v46, %v406_v41  ;;  %v491_v53 = vadd.f32 %v459_v49, %v407_v17  ;;  %v627_v31 = vmul.f32 %v2552_v3, %v2562_v5  ;;  %v628_v20 = vmul.f32 %v2552_v3, %v2157_v35 }
  0x6a   : > { %1505 = vmatprep.mubr.bf16.mxu1 %v1120_v61  ;;  %v904_v48 = vadd.f32 %v872_v11, %v819_v58  ;;  %v905_v30 = vadd.f32 %v873_v51, %v820_v15  ;;  %v1040_v39 = vmul.f32 %v1989_v62, %v2120_v28  ;;  %v1041_v18 = vmul.f32 %v1989_v62, %v2131_v44  ;;  %v945_v44 = vld [vmem:[#allocation2 + $0xe1] sm:$0xff] }
  0x6b   : > { %v574_v21 = vadd.f32 %v542_v34, %v490_v29  ;;  %v575_v23 = vadd.f32 %v543_v2, %v491_v53  ;;  %v711_v24 = vmul.f32 %v2320_v16, %v1862_v26  ;;  %v712_v57 = vmul.f32 %v2322_v60, %v1862_v26 }
  0x6c   : > { %v988_v5 = vadd.f32 %v956_v43, %v904_v48  ;;  %v989_v47 = vadd.f32 %v957_v38, %v905_v30  ;;  %v795_v3 = vmul.f32 %v1026_v50, %v1883_v32  ;;  %v796_v22 = vmul.f32 %v1027_v0, %v1883_v32 }
  0x6d   : > { %v659_v7 = vadd.f32 %v627_v31, %v574_v21  ;;  %v660_v35 = vadd.f32 %v628_v20, %v575_v23  ;;  %v880_v16 = vmul.f32 %v1885_v33, %v2162_v10  ;;  %v881_v26 = vmul.f32 %v1885_v33, %v2170_v4 }
  0x6e   : > { %v1072_v28 = vadd.f32 %v1040_v39, %v988_v5  ;;  %v1073_v36 = vadd.f32 %v1041_v18, %v989_v47  ;;  %v964_v32 = vmul.f32 %v1900_v37, %v944_v12  ;;  %v965_v0 = vmul.f32 %v1900_v37, %v945_v44 }
  0x6f   : > { %v743_v45 = vadd.f32 %v711_v24, %v659_v7  ;;  %v744_v25 = vadd.f32 %v712_v57, %v660_v35  ;;  %v1048_v56 = vmul.f32 %v1989_v62, %v1028_v59  ;;  %v1049_v10 = vmul.f32 %v1989_v62, %v1029_v54 }
  0x70   : > { %v1117_v60 = vpack.c.bf16 %v1073_v36, %v1072_v28 }
  0x71   : > { %v827_v42 = vadd.f32 %v795_v3, %v743_v45  ;;  %v828_v50 = vadd.f32 %v796_v22, %v744_v25 }
  0x72   : > { %1498 = vmatmul.mubr.bf16.gmra.mrb[4].mxu0 %v1117_v60 }
  0x73   : > { %v912_v9 = vadd.f32 %v880_v16, %v827_v42  ;;  %v913_v55 = vadd.f32 %v881_v26, %v828_v50 }
  0x75   : > { %v996_v27 = vadd.f32 %v964_v32, %v912_v9  ;;  %v997_v33 = vadd.f32 %v965_v0, %v913_v55 }
  0x77   : > { %v1080_v4 = vadd.f32 %v1048_v56, %v996_v27  ;;  %v1081_v63 = vadd.f32 %v1049_v10, %v997_v33 }
  0x79   : > { %v1121_v14 = vpack.c.bf16 %v1081_v63, %v1080_v4 }
  0x7b   : > { %1506 = vmatmul.mubr.bf16.gmra.mrb[4].mxu1 %v1121_v14 }
 0x123   : > { %v1495_v13 = vpop.f32.mrb[0].mxu0 }
 0x124   : > { %1285 = vst [vmem:[%s2401_s14 + $0x10] sm:$0xff] %v1495_v13  ;;  %v1220_v37 = vpop.f32.mrb[1].mxu0 }
 0x125   : > { %1283 = vst [vmem:[%s2401_s14] sm:$0xff] %v1220_v37  ;;  %v1496_v62 = vpop.f32.mrb[2].mxu0 }
 0x126   : > { %1286 = vst [vmem:[%s2401_s14 + $0x18] sm:$0xff] %v1496_v62  ;;  %v1223_v52 = vpop.f32.mrb[3].mxu0 }
 0x127   : > { %1284 = vst [vmem:[%s2401_s14 + $0x8] sm:$0xff] %v1223_v52 }
 0x12c   : > { %v1503_v11 = vpop.f32.mrb[0].mxu1 }
 0x12d   : > { %1293 = vst [vmem:[%s2401_s14 + $0x50] sm:$0xff] %v1503_v11  ;;  %v1252_v6 = vpop.f32.mrb[1].mxu1 }
 0x12e   : > { %1291 = vst [vmem:[%s2401_s14 + $0x40] sm:$0xff] %v1252_v6  ;;  %v1504_v40 = vpop.f32.mrb[2].mxu1 }
 0x12f   : > { %1294 = vst [vmem:[%s2401_s14 + $0x58] sm:$0xff] %v1504_v40  ;;  %v1255_v8 = vpop.f32.mrb[3].mxu1 }
 0x130   : > { %1292 = vst [vmem:[%s2401_s14 + $0x48] sm:$0xff] %v1255_v8 }
 0x145   : > { %v1499_v51 = vpop.f32.mrb[4].mxu0 }
 0x146   : > { %1289 = vst [vmem:[%s2401_s14 + $0x30] sm:$0xff] %v1499_v51  ;;  %v1236_v43 = vpop.f32.mrb[5].mxu0 }
 0x147   : > { %1287 = vst [vmem:[%s2401_s14 + $0x20] sm:$0xff] %v1236_v43  ;;  %v1500_v1 = vpop.f32.mrb[6].mxu0 }
 0x148   : > { %1290 = vst [vmem:[%s2401_s14 + $0x38] sm:$0xff] %v1500_v1  ;;  %v1239_v19 = vpop.f32.mrb[7].mxu0 }
 0x149   : > { %1288 = vst [vmem:[%s2401_s14 + $0x28] sm:$0xff] %v1239_v19 }
 0x14e   : > { %v1507_v41 = vpop.f32.mrb[4].mxu1 }
 0x14f   : > { %1297 = vst [vmem:[%s2401_s14 + $0x70] sm:$0xff] %v1507_v41  ;;  %v1268_v17 = vpop.f32.mrb[5].mxu1 }
 0x150   : > { %1295 = vst [vmem:[%s2401_s14 + $0x60] sm:$0xff] %v1268_v17  ;;  %v1508_v61 = vpop.f32.mrb[6].mxu1 }
 0x151   : > { %1298 = vst [vmem:[%s2401_s14 + $0x78] sm:$0xff] %v1508_v61  ;;  %v1271_v46 = vpop.f32.mrb[7].mxu1 }
 0x152   : > { %1296 = vst [vmem:[%s2401_s14 + $0x68] sm:$0xff] %v1271_v46 }
 0x153   : > { %1622 = shalt.err (!%p1619_p9)
}
 0x154   : > { %s1623_s8 = scalar_lea.hbm %s2422_s18, 2048  ;;  %s1627_s24 = scalar_lea.hbm %s2487_s4, 8192 }
 0x155   : > { %p1624_p10 = scmp.ne.s32.totalorder %s2422_s18, %s1623_s8  ;;  %p1628_p13 = scmp.lt.u32.totalorder %s2422_s18, %s2487_s4 }
 0x156   : > { %p1629_p0 = scmp.lt.u32.totalorder %s1627_s24, %s1623_s8  ;;  %p1631_p2 = scmp.lt.u32.totalorder %s1623_s8, %s2422_s18 }
 0x157   : > { %p1625_p11 = pnand %p1624_p10, %p1784_p3 }
 0x158   : > { %p1630_p1 = por %p1629_p0, %p1628_p13 }
 0x159   : > { %p1626_p12 = pneg %p1625_p11 }
 0x15a   : > { %p1632_p4 = por %p1631_p2, %p1630_p1 }
 0x15c   : > { %p1633_p5 = pnand %p1632_p4, %p1626_p12 }
 0x15e   : > { %1636 = shalt.err (!%p1633_p5)
}
 0x15f   : > { %s1706_s27 = smov 128   ;;  %s1707_s12 = smov 8  }
 0x160   : > { %1528 = dma.vmem_to_hbm [thread:$0]  (%p1784_p3), %s2424_s13, 2048, %s2422_s18, %s2431_s19, %s1706_s27, %s1706_s27, %s1707_s12  }
 0x161 PF: > { %p1534_p6 = scmp.ge.s32.totalorder %s1703_s22, 2  ;;  %s1331_s6 = sand.u32 1, %s1675_s15  }
 0x162   : > { %s1332_s9 = scalar_lea.sflag [#allocation5], %s1331_s6 }
 0x163   : > { %p1531_p7 = pnand %p1534_p6, %p1793_p8 }
 0x165   : > { %1670 = dma.done.wait (!%p1531_p7), %s1332_s9, 2048  }
 0x166   : > { %1672 = vsyncadd (!%p1531_p7), %s1332_s9, 4294965248  ;;  %s17_s22 = sadd.s32 1, %s1703_s22   ;;  %s2565_s15 = smov %s1679_s16 }
 0x167   : > { %p14_p9 = scmp.ge.s32.totalorder %s17_s22, 6   ;;  %s2566_s16 = smov %s1683_s17 }
 0x168   : > { %s2567_s17 = smov %s1802_s7  ;;  %s2568_s18 = smov %s1695_s20 }
 0x169   : > { %s2569_s19 = smov %s1699_s21  ;;  %s2570_s20 = smov %s2573_s25 }
 0x16a   : > { %s2571_s21 = smov %s2577_s26  ;;  %16 = sbr.rel (!%p14_p9) target bundleno = 5 (0x5), region = 77 }
 0x171   :  { %1337 = vsyncpa [#allocation5], 1 }
 0x172   :  { %1339 = vsyncpa [#allocation5 + $0x1], 1 }

</bundles_post_ra>
